<compile_context>
chip_gen: v5e
topology: v5e:2x2
jax: 0.10.0
libtpu: 0.0.40
codegen_flags: <defaults>
</compile_context>

<pallas_src>
import jax
import jax.numpy as jnp
from jax import lax
from jax.experimental import pallas as pl
from jax.experimental.pallas import tpu as pltpu

EPS = 1e-5  # PyTorch InstanceNorm2d default (affine=False, no running stats)


def _make_kernel(C, H, W, fuse, patch_dtype):
    """Per-sample kernel body.  Activations are lane-dense (C, H*W)."""
    HW = H * W
    needs_cast = jnp.dtype(patch_dtype) != jnp.dtype(jnp.bfloat16)

    def kernel(x_ref, w1_ref, w2_ref, o_ref, patches_ref):
        x = x_ref[0].astype(jnp.float32)                       # (C, HW)

        # Reflection-boundary masks, hoisted (computed once, used by both convs).
        p = lax.broadcasted_iota(jnp.int32, (1, HW), 1)
        if W & (W - 1) == 0:
            colmod = p & (W - 1)          # W power of two (demo path)
        else:
            colmod = p % W
        col_first = colmod == 0
        col_last = colmod == W - 1
        row_first = p < W
        row_last = p >= HW - W

        def conv3x3(a, w_ref):
            # Shifted copies of `a` for the 9 taps via lane rotations.
            # pltpu.roll follows np.roll semantics: out[p] = in[(p - shift) % HW].
            left = pltpu.roll(a, shift=1, axis=1)              # out[p] = a[p-1]
            right = pltpu.roll(a, shift=HW - 1, axis=1)        # out[p] = a[p+1]
            cols = (
                jnp.where(col_first, right, left),             # dj = -1 (reflect at j=0)
                a,                                             # dj =  0
                jnp.where(col_last, left, right),              # dj = +1 (reflect at j=W-1)
            )
            acc = None
            for dj in range(3):
                xc = cols[dj]
                up = pltpu.roll(xc, shift=W, axis=1)           # out[p] = xc[p-W]
                down = pltpu.roll(xc, shift=HW - W, axis=1)    # out[p] = xc[p+W]
                rows = (
                    jnp.where(row_first, down, up),            # di = -1 (reflect at i=0)
                    xc,                                        # di =  0
                    jnp.where(row_last, up, down),             # di = +1 (reflect at i=H-1)
                )
                for di in range(3):
                    tap = rows[di].astype(patch_dtype)
                    if fuse:
                        k = di * 3 + dj                        # tap index for (C, 9C) weight
                        patches_ref[k * C:(k + 1) * C, :] = tap
                    else:
                        patches_ref[di * C:(di + 1) * C, :] = tap
                if not fuse:
                    rhs = patches_ref[...]
                    if needs_cast:
                        rhs = rhs.astype(jnp.bfloat16)
                    # Grouped contraction: (C, 3C) x (3C, HW) per column offset.
                    d = jnp.dot(w_ref[dj], rhs, preferred_element_type=jnp.float32)
                    acc = d if acc is None else acc + d
            if fuse:
                rhs = patches_ref[...]
                if needs_cast:
                    rhs = rhs.astype(jnp.bfloat16)
                # Single fused im2col contraction: (C, 9C) x (9C, HW) on the MXU.
                return jnp.dot(w_ref[...], rhs, preferred_element_type=jnp.float32)
            return acc

        def instance_norm(a):
            # Two-pass IN: sum / sum-of-squares reductions (XLU), then one fused
            # normalize pass.  rsqrt goes to the EUP (free slot).
            inv_hw = jnp.float32(1.0 / HW)
            s1 = jnp.sum(a, axis=1, keepdims=True)
            s2 = jnp.sum(a * a, axis=1, keepdims=True)
            mean = s1 * inv_hw
            var = jnp.maximum(s2 * inv_hw - mean * mean, 0.0)
            return (a - mean) * lax.rsqrt(var + EPS)

        h = conv3x3(x, w1_ref)
        h = jnp.maximum(instance_norm(h), 0.0)                 # ReLU
        h = conv3x3(h, w2_ref)
        h = instance_norm(h)
        o_ref[0] = (x + h).astype(o_ref.dtype)                 # residual add

    return kernel


def _vmem_capacity_bytes():
    """Physical per-core VMEM via trace-time HW query; fallback = v7x (64 MiB)."""
    try:
        info = pltpu.get_tpu_info()
        cap = int(getattr(info, "vmem_capacity_bytes", 0) or 0)
        if cap > 0:
            return cap
    except Exception:
        pass
    return 64 << 20


def residual_block(x, w1, b1, w2, b2, *, force_fuse=None):
    """x: (N, C, H, W) f32; w*: (C, C, 3, 3); b*: (C,) (dropped, see below)."""
    # InstanceNorm(affine=False) immediately after each conv removes the
    # per-channel mean, so the conv biases are mathematically inert -> dropped.
    del b1, b2
    N, C, H, W = x.shape
    assert H >= 2 and W >= 2, "ReflectionPad2d(1) requires H, W >= 2"
    HW = H * W

    # bf16 tap scratch only when sublane offsets stay aligned to bf16 packing
    # (C % 16 == 0, i.e. all production sizes); tiny/demo C keeps f32.
    patch_dtype = jnp.bfloat16 if C % 16 == 0 else jnp.float32
    patch_bytes = jnp.dtype(patch_dtype).itemsize
    sample_f32 = C * HW * 4
    weight_bytes = 2 * 9 * C * C * 2                 # two bf16 weight tensors

    def footprint(n_patch_rows):
        return (2 * 2 * sample_f32                   # double-buffered in/out blocks
                + 6 * sample_f32                     # live f32 temps (x, h, shifted copies)
                + n_patch_rows * HW * patch_bytes    # tap scratch
                + 2 * weight_bytes                   # weights (pipeline double-buffers them)
                + (2 << 20))                         # compiler-internal slack

    cap = _vmem_capacity_bytes()
    if force_fuse is None:
        # Generation/size-aware fuse threshold: fused 9C im2col only if it fits
        # the chip's VMEM with headroom (v7x 64 MiB vs v5e/v6e 128 MiB).
        fuse = (C <= 128) and (footprint(9 * C) <= int(0.6 * cap))
    else:
        fuse = bool(force_fuse)

    x_flat = x.reshape(N, C, HW)
    if fuse:
        # w_p[o, (di*3+dj)*C + c] = w[o, c, di, dj]
        w1_p = jnp.transpose(w1, (0, 2, 3, 1)).reshape(C, 9 * C).astype(jnp.bfloat16)
        w2_p = jnp.transpose(w2, (0, 2, 3, 1)).reshape(C, 9 * C).astype(jnp.bfloat16)
        w_specs = [pl.BlockSpec((C, 9 * C), lambda n: (0, 0)),
                   pl.BlockSpec((C, 9 * C), lambda n: (0, 0))]
        patch_rows = 9 * C
    else:
        # Grouped by column offset dj: w_p[dj, o, di*C + c] = w[o, c, di, dj]
        w1_p = jnp.transpose(w1, (3, 0, 2, 1)).reshape(3, C, 3 * C).astype(jnp.bfloat16)
        w2_p = jnp.transpose(w2, (3, 0, 2, 1)).reshape(3, C, 3 * C).astype(jnp.bfloat16)
        w_specs = [pl.BlockSpec((3, C, 3 * C), lambda n: (0, 0, 0)),
                   pl.BlockSpec((3, C, 3 * C), lambda n: (0, 0, 0))]
        patch_rows = 3 * C

    # Generation-aware VMEM limit: up to 75% of physical VMEM (≈96 MiB on
    # v5e/v6e, ≈48 MiB on v7x), never below 8 MiB.
    est = footprint(patch_rows)
    vmem_limit = int(min(max(est, 8 << 20), int(0.75 * cap)))

    cost = pl.CostEstimate(
        flops=int(N * 2 * (2 * C * (9 * C) * HW)),   # two im2col matmuls per sample
        transcendentals=int(N * 2 * C),              # rsqrt per channel per IN
        bytes_accessed=int(2 * N * C * HW * 4 + weight_bytes),
    )

    kernel = _make_kernel(C, H, W, fuse, patch_dtype)
    out_flat = pl.pallas_call(
        kernel,
        out_shape=jax.ShapeDtypeStruct((N, C, HW), x.dtype),
        grid_spec=pltpu.PrefetchScalarGridSpec(
            num_scalar_prefetch=0,
            grid=(N,),
            in_specs=[pl.BlockSpec((1, C, HW), lambda n: (n, 0, 0))] + w_specs,
            out_specs=pl.BlockSpec((1, C, HW), lambda n: (n, 0, 0)),
            scratch_shapes=[pltpu.VMEM((patch_rows, HW), patch_dtype)],
        ),
        compiler_params=pltpu.CompilerParams(
            dimension_semantics=("parallel",),
            vmem_limit_bytes=vmem_limit,
        ),
        cost_estimate=cost,
    )(x_flat, w1_p, w2_p)
    return out_flat.reshape(N, C, H, W)


def residual_block_ref(x, w1, b1, w2, b2):
    """Pure-JAX reference (mirrors the PyTorch module, biases included)."""
    def conv(a, w, b):
        ap = jnp.pad(a, ((0, 0), (0, 0), (1, 1), (1, 1)), mode="reflect")
        y = lax.conv_general_dilated(
            ap, w, window_strides=(1, 1), padding="VALID",
            dimension_numbers=("NCHW", "OIHW", "NCHW"))
        return y + b[None, :, None, None]

    def inorm(a):
        m = a.mean(axis=(2, 3), keepdims=True)
        v = ((a - m) ** 2).mean(axis=(2, 3), keepdims=True)
        return (a - m) * lax.rsqrt(v + EPS)

    h = conv(x, w1, b1)
    h = jnp.maximum(inorm(h), 0.0)
    h = conv(h, w2, b2)
    h = inorm(h)
    return x + h


if __name__ == "__main__":
    N, C, H, W = 2, 4, 16, 16
    key = jax.random.PRNGKey(0)
    kx, k1, k2, k3, k4 = jax.random.split(key, 5)

    x = jax.random.normal(kx, (N, C, H, W), dtype=jnp.float32)

    # Deterministic init mimicking PyTorch Conv2d default: U(-k, k), k = 1/sqrt(C*3*3)
    bound = 1.0 / (C * 9) ** 0.5
    w1 = jax.random.uniform(k1, (C, C, 3, 3), jnp.float32, -bound, bound)
    b1 = jax.random.uniform(k2, (C,), jnp.float32, -bound, bound)
    w2 = jax.random.uniform(k3, (C, C, 3, 3), jnp.float32, -bound, bound)
    b2 = jax.random.uniform(k4, (C,), jnp.float32, -bound, bound)

    ref = jax.block_until_ready(residual_block_ref(x, w1, b1, w2, b2))

    # Exercise both contraction paths: fused 9C im2col (default at small C) and
    # the grouped 3-dot path used for large C.
    for ff in (None, False):
        out = jax.block_until_ready(residual_block(x, w1, b1, w2, b2, force_fuse=ff))
        assert out.shape == (N, C, H, W)
        err = jnp.max(jnp.abs(out - ref))
        # Tolerance covers the bf16 MXU operands (everything else is f32).
        assert jnp.allclose(out, ref, atol=3e-2, rtol=3e-2), \
            f"max abs err {err} (force_fuse={ff})"

    print("KERNEL_OK")
</pallas_src>

<mosaic_0001>
module attributes {stable_mosaic.version = 11 : i64} {
  func.func @kernel(%arg0: i32, %arg1: memref<1x4x256xf32, #tpu.memory_space<vmem>>, %arg2: memref<4x36xbf16, #tpu.memory_space<vmem>>, %arg3: memref<4x36xbf16, #tpu.memory_space<vmem>>, %arg4: memref<1x4x256xf32, #tpu.memory_space<vmem>>, %arg5: memref<36x256xf32, #tpu.memory_space<vmem>>) attributes {dimension_semantics = [#tpu.dimension_semantics<parallel>], iteration_bounds = array<i64: 2>, scalar_prefetch = 0 : i64, scratch_operands = 1 : i64, tpu.core_type = #tpu.core_type<tc>, window_params = [{transform_indices = @transform_0, window_bounds = array<i64: 1, 4, 256>}, {pipeline_mode = #tpu.pipeline_mode<synchronous>, transform_indices = @transform_1, window_bounds = array<i64: 4, 36>}, {pipeline_mode = #tpu.pipeline_mode<synchronous>, transform_indices = @transform_2, window_bounds = array<i64: 4, 36>}, {transform_indices = @transform_3, window_bounds = array<i64: 1, 4, 256>}]} {
    %c0 = arith.constant 0 : index
    %c0_0 = arith.constant 0 : index
    %c0_1 = arith.constant 0 : index
    %0 = vector.load %arg1[%c0, %c0_0, %c0_1] : memref<1x4x256xf32, #tpu.memory_space<vmem>>, vector<1x4x256xf32>
    %1 = vector.shape_cast %0 : vector<1x4x256xf32> to vector<4x256xf32>
    %2 = tpu.iota {dimensions = array<i32: 1>} : vector<1x256xi32>
    %c15_i32 = arith.constant 15 : i32
    %3 = vector.broadcast %c15_i32 : i32 to vector<1x256xi32>
    %4 = arith.andi %2, %3 : vector<1x256xi32>
    %c0_i32 = arith.constant 0 : i32
    %5 = vector.broadcast %c0_i32 : i32 to vector<1x256xi32>
    %6 = arith.cmpi eq, %4, %5 : vector<1x256xi32>
    %c15_i32_2 = arith.constant 15 : i32
    %7 = vector.broadcast %c15_i32_2 : i32 to vector<1x256xi32>
    %8 = arith.cmpi eq, %4, %7 : vector<1x256xi32>
    %c16_i32 = arith.constant 16 : i32
    %9 = vector.broadcast %c16_i32 : i32 to vector<1x256xi32>
    %10 = arith.cmpi slt, %2, %9 : vector<1x256xi32>
    %c240_i32 = arith.constant 240 : i32
    %11 = vector.broadcast %c240_i32 : i32 to vector<1x256xi32>
    %12 = arith.cmpi sge, %2, %11 : vector<1x256xi32>
    %c1_i32 = arith.constant 1 : i32
    %13 = tpu.dynamic_rotate %1 by %c1_i32 dim 1 : vector<4x256xf32>, i32 -> vector<4x256xf32>
    %c255_i32 = arith.constant 255 : i32
    %14 = tpu.dynamic_rotate %1 by %c255_i32 dim 1 : vector<4x256xf32>, i32 -> vector<4x256xf32>
    %15 = vector.shape_cast %6 : vector<1x256xi1> to vector<1x256xi1>
    %16 = vector.broadcast %15 : vector<1x256xi1> to vector<4x256xi1>
    %17 = arith.select %16, %14, %13 : vector<4x256xi1>, vector<4x256xf32>
    %18 = vector.shape_cast %8 : vector<1x256xi1> to vector<1x256xi1>
    %19 = vector.broadcast %18 : vector<1x256xi1> to vector<4x256xi1>
    %20 = arith.select %19, %13, %14 : vector<4x256xi1>, vector<4x256xf32>
    %c16_i32_3 = arith.constant 16 : i32
    %21 = tpu.dynamic_rotate %17 by %c16_i32_3 dim 1 : vector<4x256xf32>, i32 -> vector<4x256xf32>
    %c240_i32_4 = arith.constant 240 : i32
    %22 = tpu.dynamic_rotate %17 by %c240_i32_4 dim 1 : vector<4x256xf32>, i32 -> vector<4x256xf32>
    %23 = vector.shape_cast %10 : vector<1x256xi1> to vector<1x256xi1>
    %24 = vector.broadcast %23 : vector<1x256xi1> to vector<4x256xi1>
    %25 = arith.select %24, %22, %21 : vector<4x256xi1>, vector<4x256xf32>
    %26 = vector.shape_cast %12 : vector<1x256xi1> to vector<1x256xi1>
    %27 = vector.broadcast %26 : vector<1x256xi1> to vector<4x256xi1>
    %28 = arith.select %27, %21, %22 : vector<4x256xi1>, vector<4x256xf32>
    %c0_5 = arith.constant 0 : index
    %c0_6 = arith.constant 0 : index
    %29 = vector.load %arg5[%c0_5, %c0_6] : memref<36x256xf32, #tpu.memory_space<vmem>>, vector<4x256xf32>
    tpu.vector_store %arg5[%c0_5, %c0_6], %25 {strides = array<i32>} : memref<36x256xf32, #tpu.memory_space<vmem>>, vector<4x256xf32>,
    %c12 = arith.constant 12 : index
    %c0_7 = arith.constant 0 : index
    %30 = vector.load %arg5[%c12, %c0_7] : memref<36x256xf32, #tpu.memory_space<vmem>>, vector<4x256xf32>
    tpu.vector_store %arg5[%c12, %c0_7], %17 {strides = array<i32>} : memref<36x256xf32, #tpu.memory_space<vmem>>, vector<4x256xf32>,
    %c24 = arith.constant 24 : index
    %c0_8 = arith.constant 0 : index
    %31 = vector.load %arg5[%c24, %c0_8] : memref<36x256xf32, #tpu.memory_space<vmem>>, vector<4x256xf32>
    tpu.vector_store %arg5[%c24, %c0_8], %28 {strides = array<i32>} : memref<36x256xf32, #tpu.memory_space<vmem>>, vector<4x256xf32>,
    %c16_i32_9 = arith.constant 16 : i32
    %32 = tpu.dynamic_rotate %1 by %c16_i32_9 dim 1 : vector<4x256xf32>, i32 -> vector<4x256xf32>
    %c240_i32_10 = arith.constant 240 : i32
    %33 = tpu.dynamic_rotate %1 by %c240_i32_10 dim 1 : vector<4x256xf32>, i32 -> vector<4x256xf32>
    %34 = vector.shape_cast %10 : vector<1x256xi1> to vector<1x256xi1>
    %35 = vector.broadcast %34 : vector<1x256xi1> to vector<4x256xi1>
    %36 = arith.select %35, %33, %32 : vector<4x256xi1>, vector<4x256xf32>
    %37 = vector.shape_cast %12 : vector<1x256xi1> to vector<1x256xi1>
    %38 = vector.broadcast %37 : vector<1x256xi1> to vector<4x256xi1>
    %39 = arith.select %38, %32, %33 : vector<4x256xi1>, vector<4x256xf32>
    %c4 = arith.constant 4 : index
    %c0_11 = arith.constant 0 : index
    %40 = vector.load %arg5[%c4, %c0_11] : memref<36x256xf32, #tpu.memory_space<vmem>>, vector<4x256xf32>
    tpu.vector_store %arg5[%c4, %c0_11], %36 {strides = array<i32>} : memref<36x256xf32, #tpu.memory_space<vmem>>, vector<4x256xf32>,
    %c16 = arith.constant 16 : index
    %c0_12 = arith.constant 0 : index
    %41 = vector.load %arg5[%c16, %c0_12] : memref<36x256xf32, #tpu.memory_space<vmem>>, vector<4x256xf32>
    tpu.vector_store %arg5[%c16, %c0_12], %1 {strides = array<i32>} : memref<36x256xf32, #tpu.memory_space<vmem>>, vector<4x256xf32>,
    %c28 = arith.constant 28 : index
    %c0_13 = arith.constant 0 : index
    %42 = vector.load %arg5[%c28, %c0_13] : memref<36x256xf32, #tpu.memory_space<vmem>>, vector<4x256xf32>
    tpu.vector_store %arg5[%c28, %c0_13], %39 {strides = array<i32>} : memref<36x256xf32, #tpu.memory_space<vmem>>, vector<4x256xf32>,
    %c16_i32_14 = arith.constant 16 : i32
    %43 = tpu.dynamic_rotate %20 by %c16_i32_14 dim 1 : vector<4x256xf32>, i32 -> vector<4x256xf32>
    %c240_i32_15 = arith.constant 240 : i32
    %44 = tpu.dynamic_rotate %20 by %c240_i32_15 dim 1 : vector<4x256xf32>, i32 -> vector<4x256xf32>
    %45 = vector.shape_cast %10 : vector<1x256xi1> to vector<1x256xi1>
    %46 = vector.broadcast %45 : vector<1x256xi1> to vector<4x256xi1>
    %47 = arith.select %46, %44, %43 : vector<4x256xi1>, vector<4x256xf32>
    %48 = vector.shape_cast %12 : vector<1x256xi1> to vector<1x256xi1>
    %49 = vector.broadcast %48 : vector<1x256xi1> to vector<4x256xi1>
    %50 = arith.select %49, %43, %44 : vector<4x256xi1>, vector<4x256xf32>
    %c8 = arith.constant 8 : index
    %c0_16 = arith.constant 0 : index
    %51 = vector.load %arg5[%c8, %c0_16] : memref<36x256xf32, #tpu.memory_space<vmem>>, vector<4x256xf32>
    tpu.vector_store %arg5[%c8, %c0_16], %47 {strides = array<i32>} : memref<36x256xf32, #tpu.memory_space<vmem>>, vector<4x256xf32>,
    %c20 = arith.constant 20 : index
    %c0_17 = arith.constant 0 : index
    %52 = vector.load %arg5[%c20, %c0_17] : memref<36x256xf32, #tpu.memory_space<vmem>>, vector<4x256xf32>
    tpu.vector_store %arg5[%c20, %c0_17], %20 {strides = array<i32>} : memref<36x256xf32, #tpu.memory_space<vmem>>, vector<4x256xf32>,
    %c32 = arith.constant 32 : index
    %c0_18 = arith.constant 0 : index
    %53 = vector.load %arg5[%c32, %c0_18] : memref<36x256xf32, #tpu.memory_space<vmem>>, vector<4x256xf32>
    tpu.vector_store %arg5[%c32, %c0_18], %50 {strides = array<i32>} : memref<36x256xf32, #tpu.memory_space<vmem>>, vector<4x256xf32>,
    %c0_19 = arith.constant 0 : index
    %c0_20 = arith.constant 0 : index
    %54 = vector.load %arg5[%c0_19, %c0_20] : memref<36x256xf32, #tpu.memory_space<vmem>>, vector<36x256xf32>
    %55 = arith.truncf %54 : vector<36x256xf32> to vector<36x256xbf16>
    %c0_21 = arith.constant 0 : index
    %c0_22 = arith.constant 0 : index
    %56 = vector.load %arg2[%c0_21, %c0_22] : memref<4x36xbf16, #tpu.memory_space<vmem>>, vector<4x36xbf16>
    %cst = arith.constant dense<0.000000e+00> : vector<4x256xf32>
    %57 = tpu.matmul %56, %55, %cst {dimension_numbers = #tpu.dot_dimension_numbers<[1], [0], [0], [1], [0, 0, 1, 1], [], []>} : vector<4x36xbf16>, vector<36x256xbf16>, vector<4x256xf32> -> vector<4x256xf32>
    %cst_23 = arith.constant dense<0.000000e+00> : vector<4xf32>
    %58 = vector.multi_reduction <add>, %57, %cst_23 [1] : vector<4x256xf32> to vector<4xf32>
    %59 = vector.shape_cast %58 : vector<4xf32> to vector<4x1xf32>
    %60 = arith.mulf %57, %57 : vector<4x256xf32>
    %cst_24 = arith.constant dense<0.000000e+00> : vector<4xf32>
    %61 = vector.multi_reduction <add>, %60, %cst_24 [1] : vector<4x256xf32> to vector<4xf32>
    %62 = vector.shape_cast %61 : vector<4xf32> to vector<4x1xf32>
    %cst_25 = arith.constant 3.906250e-03 : f32
    %63 = vector.broadcast %cst_25 : f32 to vector<4x1xf32>
    %64 = arith.mulf %59, %63 : vector<4x1xf32>
    %cst_26 = arith.constant 3.906250e-03 : f32
    %65 = vector.broadcast %cst_26 : f32 to vector<4x1xf32>
    %66 = arith.mulf %62, %65 : vector<4x1xf32>
    %67 = arith.mulf %64, %64 : vector<4x1xf32>
    %68 = arith.subf %66, %67 : vector<4x1xf32>
    %cst_27 = arith.constant 0.000000e+00 : f32
    %69 = vector.broadcast %cst_27 : f32 to vector<4x1xf32>
    %70 = arith.maximumf %68, %69 : vector<4x1xf32>
    %71 = vector.broadcast %64 : vector<4x1xf32> to vector<4x256xf32>
    %72 = arith.subf %57, %71 : vector<4x256xf32>
    %cst_28 = arith.constant 9.99999974E-6 : f32
    %73 = vector.broadcast %cst_28 : f32 to vector<4x1xf32>
    %74 = arith.addf %70, %73 : vector<4x1xf32>
    %75 = math.rsqrt %74 : vector<4x1xf32>
    %76 = vector.broadcast %75 : vector<4x1xf32> to vector<4x256xf32>
    %77 = arith.mulf %72, %76 : vector<4x256xf32>
    %cst_29 = arith.constant 0.000000e+00 : f32
    %78 = vector.broadcast %cst_29 : f32 to vector<4x256xf32>
    %79 = arith.maximumf %77, %78 : vector<4x256xf32>
    %c1_i32_30 = arith.constant 1 : i32
    %80 = tpu.dynamic_rotate %79 by %c1_i32_30 dim 1 : vector<4x256xf32>, i32 -> vector<4x256xf32>
    %c255_i32_31 = arith.constant 255 : i32
    %81 = tpu.dynamic_rotate %79 by %c255_i32_31 dim 1 : vector<4x256xf32>, i32 -> vector<4x256xf32>
    %82 = vector.shape_cast %6 : vector<1x256xi1> to vector<1x256xi1>
    %83 = vector.broadcast %82 : vector<1x256xi1> to vector<4x256xi1>
    %84 = arith.select %83, %81, %80 : vector<4x256xi1>, vector<4x256xf32>
    %85 = vector.shape_cast %8 : vector<1x256xi1> to vector<1x256xi1>
    %86 = vector.broadcast %85 : vector<1x256xi1> to vector<4x256xi1>
    %87 = arith.select %86, %80, %81 : vector<4x256xi1>, vector<4x256xf32>
    %c16_i32_32 = arith.constant 16 : i32
    %88 = tpu.dynamic_rotate %84 by %c16_i32_32 dim 1 : vector<4x256xf32>, i32 -> vector<4x256xf32>
    %c240_i32_33 = arith.constant 240 : i32
    %89 = tpu.dynamic_rotate %84 by %c240_i32_33 dim 1 : vector<4x256xf32>, i32 -> vector<4x256xf32>
    %90 = vector.shape_cast %10 : vector<1x256xi1> to vector<1x256xi1>
    %91 = vector.broadcast %90 : vector<1x256xi1> to vector<4x256xi1>
    %92 = arith.select %91, %89, %88 : vector<4x256xi1>, vector<4x256xf32>
    %93 = vector.shape_cast %12 : vector<1x256xi1> to vector<1x256xi1>
    %94 = vector.broadcast %93 : vector<1x256xi1> to vector<4x256xi1>
    %95 = arith.select %94, %88, %89 : vector<4x256xi1>, vector<4x256xf32>
    %c0_34 = arith.constant 0 : index
    %c0_35 = arith.constant 0 : index
    %96 = vector.load %arg5[%c0_34, %c0_35] : memref<36x256xf32, #tpu.memory_space<vmem>>, vector<4x256xf32>
    tpu.vector_store %arg5[%c0_34, %c0_35], %92 {strides = array<i32>} : memref<36x256xf32, #tpu.memory_space<vmem>>, vector<4x256xf32>,
    %c12_36 = arith.constant 12 : index
    %c0_37 = arith.constant 0 : index
    %97 = vector.load %arg5[%c12_36, %c0_37] : memref<36x256xf32, #tpu.memory_space<vmem>>, vector<4x256xf32>
    tpu.vector_store %arg5[%c12_36, %c0_37], %84 {strides = array<i32>} : memref<36x256xf32, #tpu.memory_space<vmem>>, vector<4x256xf32>,
    %c24_38 = arith.constant 24 : index
    %c0_39 = arith.constant 0 : index
    %98 = vector.load %arg5[%c24_38, %c0_39] : memref<36x256xf32, #tpu.memory_space<vmem>>, vector<4x256xf32>
    tpu.vector_store %arg5[%c24_38, %c0_39], %95 {strides = array<i32>} : memref<36x256xf32, #tpu.memory_space<vmem>>, vector<4x256xf32>,
    %c16_i32_40 = arith.constant 16 : i32
    %99 = tpu.dynamic_rotate %79 by %c16_i32_40 dim 1 : vector<4x256xf32>, i32 -> vector<4x256xf32>
    %c240_i32_41 = arith.constant 240 : i32
    %100 = tpu.dynamic_rotate %79 by %c240_i32_41 dim 1 : vector<4x256xf32>, i32 -> vector<4x256xf32>
    %101 = vector.shape_cast %10 : vector<1x256xi1> to vector<1x256xi1>
    %102 = vector.broadcast %101 : vector<1x256xi1> to vector<4x256xi1>
    %103 = arith.select %102, %100, %99 : vector<4x256xi1>, vector<4x256xf32>
    %104 = vector.shape_cast %12 : vector<1x256xi1> to vector<1x256xi1>
    %105 = vector.broadcast %104 : vector<1x256xi1> to vector<4x256xi1>
    %106 = arith.select %105, %99, %100 : vector<4x256xi1>, vector<4x256xf32>
    %c4_42 = arith.constant 4 : index
    %c0_43 = arith.constant 0 : index
    %107 = vector.load %arg5[%c4_42, %c0_43] : memref<36x256xf32, #tpu.memory_space<vmem>>, vector<4x256xf32>
    tpu.vector_store %arg5[%c4_42, %c0_43], %103 {strides = array<i32>} : memref<36x256xf32, #tpu.memory_space<vmem>>, vector<4x256xf32>,
    %c16_44 = arith.constant 16 : index
    %c0_45 = arith.constant 0 : index
    %108 = vector.load %arg5[%c16_44, %c0_45] : memref<36x256xf32, #tpu.memory_space<vmem>>, vector<4x256xf32>
    tpu.vector_store %arg5[%c16_44, %c0_45], %79 {strides = array<i32>} : memref<36x256xf32, #tpu.memory_space<vmem>>, vector<4x256xf32>,
    %c28_46 = arith.constant 28 : index
    %c0_47 = arith.constant 0 : index
    %109 = vector.load %arg5[%c28_46, %c0_47] : memref<36x256xf32, #tpu.memory_space<vmem>>, vector<4x256xf32>
    tpu.vector_store %arg5[%c28_46, %c0_47], %106 {strides = array<i32>} : memref<36x256xf32, #tpu.memory_space<vmem>>, vector<4x256xf32>,
    %c16_i32_48 = arith.constant 16 : i32
    %110 = tpu.dynamic_rotate %87 by %c16_i32_48 dim 1 : vector<4x256xf32>, i32 -> vector<4x256xf32>
    %c240_i32_49 = arith.constant 240 : i32
    %111 = tpu.dynamic_rotate %87 by %c240_i32_49 dim 1 : vector<4x256xf32>, i32 -> vector<4x256xf32>
    %112 = vector.shape_cast %10 : vector<1x256xi1> to vector<1x256xi1>
    %113 = vector.broadcast %112 : vector<1x256xi1> to vector<4x256xi1>
    %114 = arith.select %113, %111, %110 : vector<4x256xi1>, vector<4x256xf32>
    %115 = vector.shape_cast %12 : vector<1x256xi1> to vector<1x256xi1>
    %116 = vector.broadcast %115 : vector<1x256xi1> to vector<4x256xi1>
    %117 = arith.select %116, %110, %111 : vector<4x256xi1>, vector<4x256xf32>
    %c8_50 = arith.constant 8 : index
    %c0_51 = arith.constant 0 : index
    %118 = vector.load %arg5[%c8_50, %c0_51] : memref<36x256xf32, #tpu.memory_space<vmem>>, vector<4x256xf32>
    tpu.vector_store %arg5[%c8_50, %c0_51], %114 {strides = array<i32>} : memref<36x256xf32, #tpu.memory_space<vmem>>, vector<4x256xf32>,
    %c20_52 = arith.constant 20 : index
    %c0_53 = arith.constant 0 : index
    %119 = vector.load %arg5[%c20_52, %c0_53] : memref<36x256xf32, #tpu.memory_space<vmem>>, vector<4x256xf32>
    tpu.vector_store %arg5[%c20_52, %c0_53], %87 {strides = array<i32>} : memref<36x256xf32, #tpu.memory_space<vmem>>, vector<4x256xf32>,
    %c32_54 = arith.constant 32 : index
    %c0_55 = arith.constant 0 : index
    %120 = vector.load %arg5[%c32_54, %c0_55] : memref<36x256xf32, #tpu.memory_space<vmem>>, vector<4x256xf32>
    tpu.vector_store %arg5[%c32_54, %c0_55], %117 {strides = array<i32>} : memref<36x256xf32, #tpu.memory_space<vmem>>, vector<4x256xf32>,
    %c0_56 = arith.constant 0 : index
    %c0_57 = arith.constant 0 : index
    %121 = vector.load %arg5[%c0_56, %c0_57] : memref<36x256xf32, #tpu.memory_space<vmem>>, vector<36x256xf32>
    %122 = arith.truncf %121 : vector<36x256xf32> to vector<36x256xbf16>
    %c0_58 = arith.constant 0 : index
    %c0_59 = arith.constant 0 : index
    %123 = vector.load %arg3[%c0_58, %c0_59] : memref<4x36xbf16, #tpu.memory_space<vmem>>, vector<4x36xbf16>
    %cst_60 = arith.constant dense<0.000000e+00> : vector<4x256xf32>
    %124 = tpu.matmul %123, %122, %cst_60 {dimension_numbers = #tpu.dot_dimension_numbers<[1], [0], [0], [1], [0, 0, 1, 1], [], []>} : vector<4x36xbf16>, vector<36x256xbf16>, vector<4x256xf32> -> vector<4x256xf32>
    %cst_61 = arith.constant dense<0.000000e+00> : vector<4xf32>
    %125 = vector.multi_reduction <add>, %124, %cst_61 [1] : vector<4x256xf32> to vector<4xf32>
    %126 = vector.shape_cast %125 : vector<4xf32> to vector<4x1xf32>
    %127 = arith.mulf %124, %124 : vector<4x256xf32>
    %cst_62 = arith.constant dense<0.000000e+00> : vector<4xf32>
    %128 = vector.multi_reduction <add>, %127, %cst_62 [1] : vector<4x256xf32> to vector<4xf32>
    %129 = vector.shape_cast %128 : vector<4xf32> to vector<4x1xf32>
    %cst_63 = arith.constant 3.906250e-03 : f32
    %130 = vector.broadcast %cst_63 : f32 to vector<4x1xf32>
    %131 = arith.mulf %126, %130 : vector<4x1xf32>
    %cst_64 = arith.constant 3.906250e-03 : f32
    %132 = vector.broadcast %cst_64 : f32 to vector<4x1xf32>
    %133 = arith.mulf %129, %132 : vector<4x1xf32>
    %134 = arith.mulf %131, %131 : vector<4x1xf32>
    %135 = arith.subf %133, %134 : vector<4x1xf32>
    %cst_65 = arith.constant 0.000000e+00 : f32
    %136 = vector.broadcast %cst_65 : f32 to vector<4x1xf32>
    %137 = arith.maximumf %135, %136 : vector<4x1xf32>
    %138 = vector.broadcast %131 : vector<4x1xf32> to vector<4x256xf32>
    %139 = arith.subf %124, %138 : vector<4x256xf32>
    %cst_66 = arith.constant 9.99999974E-6 : f32
    %140 = vector.broadcast %cst_66 : f32 to vector<4x1xf32>
    %141 = arith.addf %137, %140 : vector<4x1xf32>
    %142 = math.rsqrt %141 : vector<4x1xf32>
    %143 = vector.broadcast %142 : vector<4x1xf32> to vector<4x256xf32>
    %144 = arith.mulf %139, %143 : vector<4x256xf32>
    %145 = arith.addf %1, %144 : vector<4x256xf32>
    %c0_67 = arith.constant 0 : index
    %c0_68 = arith.constant 0 : index
    %c0_69 = arith.constant 0 : index
    %146 = vector.load %arg4[%c0_67, %c0_68, %c0_69] : memref<1x4x256xf32, #tpu.memory_space<vmem>>, vector<1x4x256xf32>
    %147 = vector.shape_cast %146 : vector<1x4x256xf32> to vector<4x256xf32>
    %148 = vector.shape_cast %145 : vector<4x256xf32> to vector<1x4x256xf32>
    tpu.vector_store %arg4[%c0_67, %c0_68, %c0_69], %148 {strides = array<i32>} : memref<1x4x256xf32, #tpu.memory_space<vmem>>, vector<1x4x256xf32>,
    return
  }
  func.func @transform_0(%arg0: i32) -> (i32, i32, i32) {
    %c0_i32 = arith.constant 0 : i32
    %c0_i32_0 = arith.constant 0 : i32
    %c0_i32_1 = arith.constant 0 : i32
    return %arg0, %c0_i32, %c0_i32_0 : i32, i32, i32
  }
  func.func @transform_1(%arg0: i32) -> (i32, i32) {
    %c0_i32 = arith.constant 0 : i32
    %c0_i32_0 = arith.constant 0 : i32
    %c0_i32_1 = arith.constant 0 : i32
    return %c0_i32, %c0_i32_0 : i32, i32
  }
  func.func @transform_2(%arg0: i32) -> (i32, i32) {
    %c0_i32 = arith.constant 0 : i32
    %c0_i32_0 = arith.constant 0 : i32
    %c0_i32_1 = arith.constant 0 : i32
    return %c0_i32, %c0_i32_0 : i32, i32
  }
  func.func @transform_3(%arg0: i32) -> (i32, i32, i32) {
    %c0_i32 = arith.constant 0 : i32
    %c0_i32_0 = arith.constant 0 : i32
    %c0_i32_1 = arith.constant 0 : i32
    return %arg0, %c0_i32, %c0_i32_0 : i32, i32, i32
  }
}

</mosaic_0001>

<bundles_post_ra>
// kernel: tpu_custom_call.1
= control target key start
LH: loop header
LB: loop body
LE: loop exit
PB: predicated region body
PF: predicated region fallthrough
CT: control target
= control target key end

     0   :  { %8 = vsyncpa [#allocation4], 0  ;;  %s1397_s0 = inlined_call_operand.hbm [shape: f32[2,4,256], index: 0, kind: input, shape index: {}]   ;;  %s1398_s1 = inlined_call_operand.hbm [shape: bf16[4,36], index: 1, kind: input, shape index: {}]   ;;  %s1399_s2 = inlined_call_operand.hbm [shape: bf16[4,36], index: 2, kind: input, shape index: {}]   ;;  %s1400_s3 = inlined_call_operand.hbm [shape: f32[2,4,256], index: 3, kind: output, shape index: {}]  }
   0x1   :  { %10 = vsyncpa [#allocation4 + $0x1], 0 }
   0x2   :  { %11 = vsyncpa [#allocation7], 0 }
   0x3   :  { %12 = vsyncpa [#allocation5], 0 }
   0x4   :  { %14 = vsyncpa [#allocation5 + $0x1], 0  ;;  %s1063_s12 = smov 0   ;;  %s1065_s13 = smov 0  }
   0x5   :  { %s1067_s14 = smov 0   ;;  %s1069_s15 = smov 0  }
   0x6 LB: > { %s1084_s16 = sadd.s32 4294967295, %s1035_s15   ;;  %s776_s17 = sadd.s32 4294967294, %s1035_s15   ;;  %s1035_s15 = sphi %s1069_s15, %s1418_s15   ;;  %s1031_s14 = sphi %s1067_s14, %s1417_s14   ;;  %s1027_s13 = sphi %s1065_s13, %s1416_s13   ;;  %s1023_s12 = sphi %s1063_s12, %s1415_s12  }
   0x7   : > { %p40_p0 = scmp.ne.s32.totalorder %s1027_s13, %s1023_s12  ;;  %p41_p1 = scmp.eq.s32.totalorder %s1084_s16, 0 }
   0x8   : > { %p106_p2 = scmp.eq.s32.totalorder %s1084_s16, 1  ;;  %p112_p3 = scmp.eq.s32.totalorder %s776_s17, 1 }
   0x9   : > { %p1093_p4 = por %p41_p1, %p40_p0  ;;  %p777_p5 = scmp.ge.s32.totalorder %s1035_s15, 1 }
   0xa   : > { %p1098_p6 = por %p112_p3, %p40_p0  ;;  %p119_p7 = scmp.lt.s32.totalorder %s1035_s15, 3 }
   0xb   : > { %s131_s22 = sshll.u32 %s1398_s1, 4  ;;  %s1037_s24 = smov [#allocation6]   ;;  %s132_s22 = int_to_ptr.hbm [resolvable:$true] %s131_s22 }
   0xc   : > { %p1106_p8 = pnand %p777_p5, %p119_p7  ;;  %s133_s25 = sshll.u32 %s1037_s24, 4  ;;  %s134_s25 = int_to_ptr.vmem [resolvable:$true] %s133_s25 }
   0xd   : > { %s143_s28 = sshll.u32 %s1399_s2, 4  ;;  %s1038_s29 = smov [#allocation8]   ;;  %s144_s28 = int_to_ptr.hbm [resolvable:$true] %s143_s28 }
   0xe   : > { %p812_p10 = pneg %p1106_p8  ;;  %s145_s30 = sshll.u32 %s1038_s29, 4  ;;  %s146_s30 = int_to_ptr.vmem [resolvable:$true] %s145_s30 }
   0xf   : > { %s1119_s4 = sadd.s32 1, %s1035_s15   ;;  %s27_s5 = sadd.s32 1, %s1031_s14 }
  0x10   : > { %p813_p11 = pnand %p812_p10, %p41_p1  ;;  %s24_s6 = ssub.s32 %s1035_s15, %s1119_s4 }
  0x11   : > { %p34_p12 = scmp.ne.s32.totalorder %s1031_s14, %s1027_s13  ;;  %p25_p13 = scmp.eq.s32.totalorder %s24_s6, 0 }
  0x12   : > { %815 = dma.hbm_to_vmem [thread:$0]  (!%p813_p11), %s132_s22, 32, %s134_s25, [#allocation7]  }
  0x13   : > { %818 = dma.hbm_to_vmem [thread:$0]  (!%p813_p11), %s144_s28, 32, %s146_s30, [#allocation7]  }
  0x14   : > { %p35_p0 = scmp.eq.s32.totalorder %s1035_s15, 0  ;;  %p1129_p3 = por %p106_p2, %p34_p12 }
  0x15   : > { %p829_p5 = scmp.lt.s32.totalorder %s1035_s15, 2  ;;  %s156_s9 = sand.u32 1, %s1031_s14  }
  0x16   : > { %s1135_s8 = scalar_select %p25_p13, %s1031_s14, %s27_s5  }
  0x17   : > { %p36_p7 = por %p35_p0, %p34_p12  ;;  %s781_s10 = sshll.u32 %s156_s9, 3 }
  0x18   : > { %s798_s11 = sshll.u32 %s1035_s15, 3  ;;  %s160_s22 = scalar_lea.vmem [#allocation3], %s781_s10 }
  0x19   : > { %s165_s21 = scalar_lea.hbm %s1397_s0, %s798_s11  ;;  %s169_s24 = sshll.u32 %s160_s22, 4  ;;  %s170_s24 = int_to_ptr.vmem [resolvable:$true] %s169_s24 }
  0x1a   : > { %s167_s25 = sshll.u32 %s165_s21, 4  ;;  %p1142_p2 = pnand %p829_p5, %p36_p7  ;;  %s168_s25 = int_to_ptr.hbm [resolvable:$true] %s167_s25 }
  0x1b   : > { %s157_s27 = scalar_lea.sflag [#allocation4], %s156_s9  ;;  %s935_s28 = sshra.s32 %s168_s25, 4  ;;  %s936_s28 = int_to_ptr.hbm [resolvable:$true] %s935_s28 }
  0x1c   : > { %s937_s29 = scalar_lea.hbm %s936_s28, 8  ;;  %p939_p11 = pneg %p1142_p2 }
  0x1d   : > { %p938_p10 = scmp.ne.s32.totalorder %s936_s28, %s937_s29  ;;  %s942_s6 = scalar_lea.hbm %s1397_s0, 16 }
  0x1e   : > { %p943_p0 = scmp.lt.s32.totalorder %s936_s28, %s1397_s0  ;;  %p944_p5 = scmp.lt.s32.totalorder %s942_s6, %s937_s29 }
  0x1f   : > { %p940_p12 = pnand %p939_p11, %p938_p10 }
  0x20   : > { %p945_p7 = por %p944_p5, %p943_p0 }
  0x21   : > { %p941_p13 = pneg %p940_p12 }
  0x23   : > { %p946_p9 = pnand %p945_p7, %p941_p13 }
  0x25   : > { %949 = shalt.err (!%p946_p9)
}
  0x26   : > { %822 = dma.hbm_to_vmem [thread:$0]  (!%p1142_p2), %s168_s25, 128, %s170_s24, %s157_s27  }
  0x27   : > { %178 = sbr.rel (%p1106_p8) target bundleno = 1208 (0x4b8), region = 32  ;;  %s1159_s9 = sand.u32 (!%p1106_p8), 1, %s1027_s13  }
  0x28   : > { %s785_s17 = sshll.u32 (!%p1106_p8), %s1159_s9, 3  ;;  %s181_s20 = scalar_lea.sflag (!%p1106_p8), [#allocation4], %s1159_s9 }
  0x29   : > { %s184_s21 = scalar_lea.vmem (!%p1106_p8), [#allocation3], %s785_s17 }
  0x2c   : > { %1010 = dma.done.wait (%p1093_p4), %s181_s20, 128  }
  0x2d   : > { %1012 = vsyncadd (%p1093_p4), %s181_s20, 4294967168 }
  0x2e   : > { %1014 = dma.done.wait (%p41_p1), [#allocation7], 64  }
  0x2f   : > { %1016 = vsyncadd (%p41_p1), [#allocation7], 4294967232  ;;  %v1173_v0 = vld [vmem:[%s184_s21] sm:$0xff]  ;;  %s1039_s23 = smov 1   ;;  %s1040_s18 = smov 127   ;;  %v220_v11 = vlaneseq  ;;  %vm405_vm9 = vcmask 1041408  }
  0x30   : > { %234 = vst [vmem:[#allocation1] ss:$2 sm:$0xff] %v1173_v0  ;;  %s1041_s22 = smov 16   ;;  %s1042_s24 = smov 112   ;;  %vm401_vm10 = vcmask 293888   ;;  %vm438_vm11 = vcmask 1043456  }
  0x31   : > { %v1188_v13 = vand.u32 127, %v220_v11  ;;  %s799_s25 = sshll.u32 %s1084_s16, 3  ;;  %s217_s29 = scalar_lea.vmem [#allocation9], %s785_s17 }
  0x32   : > { %s682_s28 = scalar_lea.hbm %s1400_s3, %s799_s25  ;;  %s684_s30 = sshll.u32 %s217_s29, 4  ;;  %s685_s30 = int_to_ptr.vmem [resolvable:$true] %s684_s30 }
  0x33   : > { %v1191_v14 = vadd.s32 128, %v1188_v13  ;;  %v223_v16 = vand.u32 15, %v1188_v13  ;;  %vm243_vm0 = vcmp.lt.s32.totalorder %v1188_v13, 1  ;;  %vm255_vm1 = vcmp.lt.s32.totalorder %v1188_v13, 127  ;;  %s686_s5 = sshll.u32 %s682_s28, 4  ;;  %s671_s16 = scalar_lea.sflag [#allocation5], %s1159_s9  ;;  %s687_s5 = int_to_ptr.hbm [resolvable:$true] %s686_s5 }
  0x34   : > { %vm229_vm6 = vcmp.lt.s32.totalorder %v1188_v13, 16  ;;  %vm280_vm8 = vcmp.lt.s32.totalorder %v1188_v13, 112  ;;  %s979_s6 = sshra.s32 %s687_s5, 4  ;;  %s985_s17 = scalar_lea.hbm %s1400_s3, 16  ;;  %s980_s6 = int_to_ptr.hbm [resolvable:$true] %s979_s6 }
  0x35   : > { %v224_v17 = vand.u32 15, %v1191_v14  ;;  %vm1197_vm2 = vcmp.eq.s32.totalorder %v223_v16, 15  ;;  %vm1205_vm4 = vcmp.eq.s32.totalorder %v223_v16, 0  ;;  %vm232_vm7 = vcmp.ge.s32.totalorder %v1191_v14, 240  ;;  %v595_v14 = vld [vmem:[#allocation8] sm:$0x3]  ;;  %p986_p9 = scmp.lt.s32.totalorder %s980_s6, %s1400_s3 }
  0x36   : > { %s981_s10 = scalar_lea.hbm %s980_s6, 8 }
  0x37   : > { %v235_v1 = vld.sshfl [vmem:[#allocation1] sm:$0xff pattern:$0x75316420]  ;;  %v236_v2 = vld.sshfl [vmem:[#allocation1 + $0x8] sm:$0xff pattern:$0x75316420]  ;;  %p982_p1 = scmp.ne.s32.totalorder %s980_s6, %s981_s10  ;;  %p987_p2 = scmp.lt.s32.totalorder %s985_s17, %s981_s10 }
  0x38   : > { %239 = vrot.lane.b32.xlu0 %v235_v1, %s1039_s23  ;;  %246 = vst [vmem:[#allocation1] ss:$2 sm:$0xff] %v1173_v0  ;;  %vm1201_vm3 = vcmp.eq.s32.totalorder %v224_v17, 15  ;;  %vm1209_vm5 = vcmp.eq.s32.totalorder %v224_v17, 0 }
  0x39   : > { %p983_p4 = pnand %p982_p1, %p1129_p3  ;;  %p988_p10 = por %p987_p2, %p986_p9 }
  0x3b   : > { %p984_p8 = pneg %p983_p4 }
  0x3d   : > { %p989_p11 = pnand %p988_p10, %p984_p8 }
  0x3f   : > { %v247_v3 = vld.sshfl [vmem:[#allocation1] sm:$0xff pattern:$0x75316420]  ;;  %v248_v4 = vld.sshfl [vmem:[#allocation1 + $0x8] sm:$0xff pattern:$0x75316420] }
  0x40   : > { %241 = vrot.lane.b32.xlu0 %v236_v2, %s1039_s23  ;;  %251 = vrot.lane.b32.xlu1 %v247_v3, %s1040_s18  ;;  %307 = vst [vmem:[#allocation1] ss:$2 sm:$0xff] %v1173_v0 }
  0x47   : > { %v309_v5 = vld.sshfl [vmem:[#allocation1 + $0x8] sm:$0xff pattern:$0x75316420]  ;;  %v308_v6 = vld.sshfl [vmem:[#allocation1] sm:$0xff pattern:$0x75316420] }
  0x48   : > { %253 = vrot.lane.b32.xlu1 %v248_v4, %s1040_s18  ;;  %314 = vrot.lane.b32.xlu0 %v309_v5, %s1041_s22  ;;  %318 = vst [vmem:[#allocation1] ss:$2 sm:$0xff] %v1173_v0 }
  0x49   : > { %312 = vrot.lane.b32.xlu2 %v308_v6, %s1041_s22 }
  0x4f   : > { %v319_v7 = vld.sshfl [vmem:[#allocation1] sm:$0xff pattern:$0x75316420]  ;;  %v320_v8 = vld.sshfl [vmem:[#allocation1 + $0x8] sm:$0xff pattern:$0x75316420] }
  0x50   : > { %323 = vrot.lane.b32.xlu1 %v319_v7, %s1042_s24  ;;  %341 = vst [vmem:[#allocation1] ss:$2 sm:$0xff] %v1173_v0 }
  0x51   : > { %325 = vrot.lane.b32.xlu2 %v320_v8, %s1042_s24 }
  0x57   : > { %v342_v9 = vld.sshfl [vmem:[#allocation1] sm:$0xff pattern:$0x75316420]  ;;  %v343_v10 = vld.sshfl [vmem:[#allocation1 + $0x8] sm:$0xff pattern:$0x75316420] }
  0x58   : > { %346 = vst [vmem:[#allocation2 + $0x8] sm:$0xf] %v342_v9 }
  0x59   : > { %347 = vst [vmem:[#allocation2 + $0x30] sm:$0xf] %v343_v10 }
  0xa3   : > { %v313_v36 = vpop.permute.xlu2 %312 }
  0xaa   : > { %v240_v12 = vpop.permute.xlu0 %239 }
  0xab   : > { %v326_v41 = vpop.permute.xlu2 %325 }
  0xb2   : > { %v252_v15 = vpop.permute.xlu1 %251  ;;  %v242_v18 = vpop.permute.xlu0 %241 }
  0xb3   : > { %v244_v24 = vsel %vm243_vm0, %v240_v12, %v242_v18  ;;  %v245_v25 = vsel %vm243_vm0, %v242_v18, %v240_v12 }
  0xba   : > { %v254_v23 = vpop.permute.xlu1 %253  ;;  %v315_v37 = vpop.permute.xlu0 %314 }
  0xbb   : > { %v256_v26 = vsel %vm255_vm1, %v252_v15, %v254_v23  ;;  %v257_v27 = vsel %vm255_vm1, %v254_v23, %v252_v15  ;;  %v316_v38 = vsel %vm229_vm6, %v313_v36, %v315_v37  ;;  %v317_v40 = vsel %vm229_vm6, %v315_v37, %v313_v36 }
  0xbc   : > { %v268_v28 = vsel %vm1197_vm2, %v245_v25, %v256_v26  ;;  %v269_v29 = vsel %vm1201_vm3, %v244_v24, %v257_v27  ;;  %v262_v30 = vsel %vm1205_vm4, %v256_v26, %v245_v25  ;;  %v263_v31 = vsel %vm1209_vm5, %v257_v27, %v244_v24 }
  0xbd   : > { %v376_v32 = vrot.slane %v268_v28, 4  ;;  %362 = vrot.lane.b32.xlu0 %v268_v28, %s1042_s24  ;;  %356 = vrot.lane.b32.xlu2 %v268_v28, %s1041_s22  ;;  %v377_v33 = vrot.slane %v269_v29, 4  ;;  %v299_v34 = vrot.slane %v262_v30, 4  ;;  %v300_v35 = vrot.slane %v263_v31, 4 }
  0xbe   : > { %364 = vrot.lane.b32.xlu1 %v269_v29, %s1042_s24  ;;  %v336_v39 = vrot.slane %v316_v38, 4 }
  0xbf   : > { %380 = vst [vmem:[#allocation2 + $0x8] sm:$0xf0] %v376_v32 }
  0xc0   : > { %381 = vst [vmem:[#allocation2 + $0x30] sm:$0xf0] %v377_v33 }
  0xc1   : > { %303 = vst [vmem:[#allocation2 + $0x18] sm:$0xf0] %v299_v34 }
  0xc2   : > { %304 = vst [vmem:[#allocation2 + $0x10] sm:$0xf0] %v300_v35  ;;  %v324_v42 = vpop.permute.xlu1 %323 }
  0xc3   : > { %340 = vst [vmem:[#allocation2] sm:$0xf0] %v336_v39  ;;  %v327_v43 = vsel %vm280_vm8, %v324_v42, %v326_v41  ;;  %v328_v44 = vsel %vm280_vm8, %v326_v41, %v324_v42 }
  0xc4   : > { %v329_v45 = vsel %vm229_vm6, %v327_v43, %v317_v40  ;;  %v332_v46 = vsel %vm232_vm7, %v316_v38, %v328_v44  ;;  %v350_v47 = vrot.slane %v327_v43, 4 }
  0xc5   : > { %270 = vrot.lane.b32.xlu0 %v262_v30, %s1041_s22  ;;  %358 = vrot.lane.b32.xlu2 %v269_v29, %s1041_s22  ;;  %v335_v48 = vrot.slane %v329_v45, 4  ;;  %v351_v49 = vrot.slane %v332_v46, 4 }
  0xc6   : > { %272 = vrot.lane.b32.xlu1 %v263_v31, %s1041_s22  ;;  %354 = vst [vmem:[#allocation2 + $0x48] sm:$0xf0] %v350_v47  ;;  %v388_v15 = vld [vmem:[#allocation2 + $0x8] sm:$0xff] }
  0xc7   : > { %339 = vst [vmem:[#allocation2 + $0x20] sm:$0xf0] %v335_v48  ;;  %v389_v18 = vld [vmem:[#allocation2 + $0x30] sm:$0xff] }
  0xc8   : > { %355 = vst [vmem:[#allocation2 + $0x38] sm:$0xf0] %v351_v49 }
  0xcd   : > { %278 = vrot.lane.b32.xlu0 %v263_v31, %s1042_s24  ;;  %276 = vrot.lane.b32.xlu2 %v262_v30, %s1042_s24  ;;  %v400_v31 = vld [vmem:[#allocation6] sm:$0x3] }
 0x117   : > { %v357_v50 = vpop.permute.xlu2 %356 }
 0x11f   : > { %v359_v51 = vpop.permute.xlu2 %358 }
 0x120   : > { %v360_v52 = vsel %vm229_vm6, %v357_v50, %v359_v51  ;;  %v361_v55 = vsel %vm229_vm6, %v359_v51, %v357_v50 }
 0x121   : > { %373 = vst [vmem:[#allocation2 + $0x10] sm:$0xf] %v360_v52 }
 0x127   : > { %v277_v6 = vpop.permute.xlu2 %276 }
 0x128   : > { %v387_v29 = vld [vmem:[#allocation2 + $0x10] sm:$0xff] }
 0x12f   : > { %v363_v53 = vpop.permute.xlu0 %362 }
 0x130   : > { %v365_v54 = vpop.permute.xlu1 %364 }
 0x131   : > { %v366_v56 = vsel %vm280_vm8, %v363_v53, %v365_v54  ;;  %v367_v57 = vsel %vm280_vm8, %v365_v54, %v363_v53 }
 0x132   : > { %v368_v58 = vsel %vm229_vm6, %v366_v56, %v361_v55  ;;  %v371_v59 = vsel %vm232_vm7, %v360_v52, %v367_v57  ;;  %382 = vst [vmem:[#allocation2 + $0x40] sm:$0xf] %v366_v56 }
 0x133   : > { %372 = vst [vmem:[#allocation2 + $0x18] sm:$0xf] %v368_v58 }
 0x134   : > { %383 = vst [vmem:[#allocation2 + $0x28] sm:$0xf] %v371_v59 }
 0x137   : > { %v271_v60 = vpop.permute.xlu0 %270 }
 0x138   : > { %v273_v61 = vpop.permute.xlu1 %272 }
 0x139   : > { %v274_v62 = vsel %vm229_vm6, %v271_v60, %v273_v61  ;;  %v392_v63 = vld [vmem:[#allocation2 + $0x40] sm:$0xf]  ;;  %v275_v8 = vsel %vm229_vm6, %v273_v61, %v271_v60 }
 0x13a   : > { %296 = vst [vmem:[#allocation2] sm:$0xf] %v274_v62  ;;  %v398_v1 = vpack.c.bf16 %v392_v63, %v392_v63  ;;  %v386_v26 = vld [vmem:[#allocation2 + $0x18] sm:$0xff] }
 0x13b   : > { %v393_v2 = vld [vmem:[#allocation2 + $0x28] sm:$0xf] }
 0x13c   : > { %v407_v3 = vsel %vm405_vm9, %v398_v1, 0  ;;  %v399_v4 = vpack.c.bf16 %v393_v2, %v393_v2 }
 0x13d   : > { %417 = vmatpush.bf16.msra.mxu0 %v407_v3 }
 0x13e   : > { %v410_v5 = vsel %vm405_vm9, %v399_v4, 0 }
 0x13f   : > { %430 = vmatpush.bf16.msra.mxu1 %v410_v5  ;;  %v279_v7 = vpop.permute.xlu0 %278 }
 0x140   : > { %v281_v9 = vsel %vm280_vm8, %v277_v6, %v279_v7  ;;  %v282_v10 = vsel %vm280_vm8, %v279_v7, %v277_v6 }
 0x141   : > { %v287_v11 = vsel %vm229_vm6, %v281_v9, %v275_v8  ;;  %v294_v12 = vsel %vm232_vm7, %v274_v62, %v282_v10  ;;  %305 = vst [vmem:[#allocation2 + $0x48] sm:$0xf] %v281_v9  ;;  %v385_v27 = vld [vmem:[#allocation2] sm:$0xff] }
 0x142   : > { %295 = vst [vmem:[#allocation2 + $0x20] sm:$0xf] %v287_v11  ;;  %v395_v30 = vpack.c.bf16 %v387_v29, %v385_v27 }
 0x143   : > { %306 = vst [vmem:[#allocation2 + $0x38] sm:$0xf] %v294_v12 }
 0x148   : > { %v390_v16 = vld [vmem:[#allocation2 + $0x48] sm:$0xff] }
 0x149   : > { %v396_v17 = vpack.c.bf16 %v390_v16, %v388_v15  ;;  %v384_v24 = vld [vmem:[#allocation2 + $0x20] sm:$0xff] }
 0x14a   : > { %v391_v23 = vld [vmem:[#allocation2 + $0x38] sm:$0xff]  ;;  %v394_v28 = vpack.c.bf16 %v386_v26, %v384_v24 }
 0x14b   : > { %418 = vmatpush.bf16.msra.mxu0 %v396_v17  ;;  %v397_v25 = vpack.c.bf16 %v391_v23, %v389_v18 }
 0x14d   : > { %431 = vmatpush.bf16.msra.mxu1 %v397_v25 }
 0x14f   : > { %419 = vmatpush.bf16.msra.mxu0 %v394_v28 }
 0x151   : > { %432 = vmatpush.bf16.msra.mxu1 %v395_v30 }
 0x152   : > { %789 = vmatmul.msk.bf16.vlgmr.msra.gmra.mxu0 %vm401_vm10, %v400_v31 }
 0x154   : > { %790 = vmatmul.msk.bf16.vlgmr.msra.gmra.mxu1 %vm401_vm10, %v400_v31 }
 0x1cf   : > { %v421_v32 = vpop.f32.mrf.mxu0 }
 0x1d0   : > { %v444_v33 = vmul.f32 %v421_v32, %v421_v32  ;;  %v439_v34 = vsel %vm438_vm11, %v421_v32, 0.0 }
 0x1d1   : > { %v434_v35 = vpop.f32.mrf.mxu1 }
 0x1d2   : > { %v445_v36 = vmul.f32 %v434_v35, %v434_v35  ;;  %v440_v37 = vsel %vm438_vm11, %v434_v35, 0.0  ;;  %v446_v38 = vsel %vm438_vm11, %v444_v33, 0.0 }
 0x1d3   : > { %v441_v39 = vadd.f32 %v440_v37, %v439_v34 }
 0x1d4   : > { %v447_v40 = vsel %vm438_vm11, %v445_v36, 0.0 }
 0x1d5   : > { %442 = vadd.xlane.f32.xlu1 %v441_v39  ;;  %v448_v41 = vadd.f32 %v447_v40, %v446_v38 }
 0x1d7   : > { %449 = vadd.xlane.f32.xlu2 %v448_v41  ;;  %v423_v42 = vpop.f32.mrf.mxu0 }
 0x1d9   : > { %v436_v43 = vpop.f32.mrf.mxu1 }
 0x248   : > { %v443_v44 = vpop.xlane.xlu1 %442 }
 0x249   : > { %v451_v45 = vmul.f32 0.00390625, %v443_v44 }
 0x24a   : > { %v450_v46 = vpop.xlane.xlu2 %449 }
 0x24b   : > { %v452_v47 = vmul.f32 0.00390625, %v450_v46  ;;  %v453_v48 = vmul.f32 %v451_v45, %v451_v45  ;;  %v456_v58 = vsub.f32 %v421_v32, %v451_v45  ;;  %v457_v59 = vsub.f32 %v434_v35, %v451_v45 }
 0x24d   : > { %v454_v49 = vsub.f32 %v452_v47, %v453_v48 }
 0x24f   : > { %v455_v50 = vmax.f32 %v454_v49, 0.0 }
 0x251   : > { %v458_v51 = vadd.f32 1e-05, %v455_v50 }
 0x253   : > { %871 = vrsqrt.f32 %v458_v51  ;;  %vm465_vm13 = vweird.f32 %v458_v51 }
 0x259   : > { %v872_v52 = vpop.eup %871 }
 0x25a   : > { %v460_v53 = vmul.f32 %v872_v52, %v458_v51  ;;  %vm466_vm12 = vweird.f32 %v872_v52 }
 0x25b   : > { %vm467_vm14 = vmor %vm465_vm13, %vm466_vm12 }
 0x25c   : > { %v461_v54 = vmul.f32 %v872_v52, %v460_v53 }
 0x25e   : > { %v462_v55 = vmul.f32 0.5, %v461_v54 }
 0x260   : > { %v463_v56 = vsub.f32 1.5, %v462_v55 }
 0x262   : > { %v464_v57 = vmul.f32 %v872_v52, %v463_v56 }
 0x264   : > { %v468_v60 = vsel %vm467_vm14, %v872_v52, %v464_v57 }
 0x265   : > { %v469_v61 = vmul.f32 %v468_v60, %v456_v58  ;;  %v470_v62 = vmul.f32 %v468_v60, %v457_v59 }
 0x267   : > { %v472_v63 = vmax.f32 %v470_v62, 0.0  ;;  %v471_v1 = vmax.f32 %v469_v61, 0.0 }
 0x269   : > { %525 = vrot.lane.b32.xlu1 %v472_v63, %s1042_s24  ;;  %542 = vst [vmem:[#allocation2 + $0x30] sm:$0xf] %v472_v63  ;;  %523 = vrot.lane.b32.xlu2 %v471_v1, %s1042_s24 }
 0x26a   : > { %541 = vst [vmem:[#allocation2 + $0x8] sm:$0xf] %v471_v1  ;;  %473 = vrot.lane.b32.xlu0 %v471_v1, %s1039_s23 }
 0x272   : > { %475 = vrot.lane.b32.xlu0 %v472_v63, %s1039_s23 }
 0x27a   : > { %479 = vrot.lane.b32.xlu0 %v471_v1, %s1040_s18 }
 0x282   : > { %481 = vrot.lane.b32.xlu0 %v472_v63, %s1040_s18 }
 0x28a   : > { %517 = vrot.lane.b32.xlu0 %v471_v1, %s1041_s22 }
 0x292   : > { %519 = vrot.lane.b32.xlu0 %v472_v63, %s1041_s22 }
 0x2c3   : > { %v524_v2 = vpop.permute.xlu2 %523 }
 0x2db   : > { %v526_v3 = vpop.permute.xlu1 %525 }
 0x2dc   : > { %v527_v4 = vsel %vm280_vm8, %v524_v2, %v526_v3  ;;  %v474_v5 = vpop.permute.xlu0 %473  ;;  %v528_v22 = vsel %vm280_vm8, %v526_v3, %v524_v2 }
 0x2dd   : > { %v545_v6 = vrot.slane %v527_v4, 4 }
 0x2df   : > { %549 = vst [vmem:[#allocation2 + $0x48] sm:$0xf0] %v545_v6 }
 0x2e4   : > { %v476_v7 = vpop.permute.xlu0 %475 }
 0x2e5   : > { %v477_v10 = vsel %vm243_vm0, %v474_v5, %v476_v7  ;;  %v478_v11 = vsel %vm243_vm0, %v476_v7, %v474_v5 }
 0x2ec   : > { %v480_v8 = vpop.permute.xlu0 %479 }
 0x2f4   : > { %v482_v9 = vpop.permute.xlu0 %481 }
 0x2f5   : > { %v483_v12 = vsel %vm255_vm1, %v480_v8, %v482_v9  ;;  %v484_v15 = vsel %vm255_vm1, %v482_v9, %v480_v8 }
 0x2f6   : > { %v488_v16 = vsel %vm1201_vm3, %v477_v10, %v484_v15  ;;  %v487_v17 = vsel %vm1197_vm2, %v478_v11, %v483_v12  ;;  %v486_v18 = vsel %vm1209_vm5, %v484_v15, %v477_v10  ;;  %v485_v23 = vsel %vm1205_vm4, %v483_v12, %v478_v11 }
 0x2f7   : > { %553 = vrot.lane.b32.xlu2 %v488_v16, %s1041_s22  ;;  %v572_v24 = vrot.slane %v488_v16, 4  ;;  %557 = vrot.lane.b32.xlu1 %v487_v17, %s1042_s24  ;;  %v571_v25 = vrot.slane %v487_v17, 4  ;;  %v510_v26 = vrot.slane %v486_v18, 4  ;;  %v509_v20 = vrot.slane %v485_v23, 4 }
 0x2f8   : > { %551 = vrot.lane.b32.xlu0 %v487_v17, %s1041_s22 }
 0x2f9   : > { %576 = vst [vmem:[#allocation2 + $0x30] sm:$0xf0] %v572_v24 }
 0x2fa   : > { %575 = vst [vmem:[#allocation2 + $0x8] sm:$0xf0] %v571_v25 }
 0x2fb   : > { %514 = vst [vmem:[#allocation2 + $0x10] sm:$0xf0] %v510_v26 }
 0x2fc   : > { %v518_v19 = vpop.permute.xlu0 %517  ;;  %513 = vst [vmem:[#allocation2 + $0x18] sm:$0xf0] %v509_v20 }
 0x2ff   : > { %491 = vrot.lane.b32.xlu2 %v486_v18, %s1041_s22  ;;  %495 = vrot.lane.b32.xlu1 %v485_v23, %s1042_s24 }
 0x300   : > { %559 = vrot.lane.b32.xlu0 %v488_v16, %s1042_s24  ;;  %v584_v63 = vld [vmem:[#allocation2 + $0x30] sm:$0xff] }
 0x301   : > { %v583_v60 = vld [vmem:[#allocation2 + $0x8] sm:$0xff] }
 0x304   : > { %v520_v21 = vpop.permute.xlu0 %519 }
 0x305   : > { %v521_v27 = vsel %vm229_vm6, %v518_v19, %v520_v21  ;;  %v522_v28 = vsel %vm229_vm6, %v520_v21, %v518_v19 }
 0x306   : > { %v529_v29 = vsel %vm229_vm6, %v527_v4, %v522_v28  ;;  %v532_v30 = vsel %vm232_vm7, %v521_v27, %v528_v22  ;;  %v536_v31 = vrot.slane %v521_v27, 4 }
 0x307   : > { %v535_v32 = vrot.slane %v529_v29, 4  ;;  %v546_v33 = vrot.slane %v532_v30, 4 }
 0x308   : > { %540 = vst [vmem:[#allocation2] sm:$0xf0] %v536_v31  ;;  %489 = vrot.lane.b32.xlu0 %v485_v23, %s1041_s22 }
 0x309   : > { %539 = vst [vmem:[#allocation2 + $0x20] sm:$0xf0] %v535_v32 }
 0x30a   : > { %550 = vst [vmem:[#allocation2 + $0x38] sm:$0xf0] %v546_v33 }
 0x310   : > { %497 = vrot.lane.b32.xlu0 %v486_v18, %s1042_s24 }
 0x351   : > { %v554_v34 = vpop.permute.xlu2 %553 }
 0x359   : > { %v492_v44 = vpop.permute.xlu2 %491 }
 0x369   : > { %v558_v37 = vpop.permute.xlu1 %557 }
 0x36a   : > { %v552_v35 = vpop.permute.xlu0 %551 }
 0x36b   : > { %v555_v36 = vsel %vm229_vm6, %v552_v35, %v554_v34  ;;  %v556_v39 = vsel %vm229_vm6, %v554_v34, %v552_v35 }
 0x36c   : > { %568 = vst [vmem:[#allocation2 + $0x10] sm:$0xf] %v555_v36 }
 0x371   : > { %v496_v53 = vpop.permute.xlu1 %495 }
 0x372   : > { %v560_v38 = vpop.permute.xlu0 %559 }
 0x373   : > { %v561_v40 = vsel %vm280_vm8, %v558_v37, %v560_v38  ;;  %v562_v41 = vsel %vm280_vm8, %v560_v38, %v558_v37  ;;  %v582_v13 = vld [vmem:[#allocation2 + $0x10] sm:$0xff] }
 0x374   : > { %v563_v42 = vsel %vm229_vm6, %v561_v40, %v556_v39  ;;  %v566_v43 = vsel %vm232_vm7, %v555_v36, %v562_v41  ;;  %577 = vst [vmem:[#allocation2 + $0x40] sm:$0xf] %v561_v40 }
 0x375   : > { %567 = vst [vmem:[#allocation2 + $0x18] sm:$0xf] %v563_v42 }
 0x376   : > { %578 = vst [vmem:[#allocation2 + $0x28] sm:$0xf] %v566_v43 }
 0x37a   : > { %v490_v45 = vpop.permute.xlu0 %489 }
 0x37b   : > { %v493_v46 = vsel %vm229_vm6, %v490_v45, %v492_v44  ;;  %v587_v47 = vld [vmem:[#allocation2 + $0x40] sm:$0xf]  ;;  %v494_v55 = vsel %vm229_vm6, %v492_v44, %v490_v45 }
 0x37c   : > { %506 = vst [vmem:[#allocation2] sm:$0xf] %v493_v46  ;;  %v593_v48 = vpack.c.bf16 %v587_v47, %v587_v47  ;;  %v581_v4 = vld [vmem:[#allocation2 + $0x18] sm:$0xff] }
 0x37d   : > { %v588_v49 = vld [vmem:[#allocation2 + $0x28] sm:$0xf] }
 0x37e   : > { %v600_v50 = vsel %vm405_vm9, %v593_v48, 0  ;;  %v594_v51 = vpack.c.bf16 %v588_v49, %v588_v49 }
 0x37f   : > { %610 = vmatpush.bf16.msra.mxu2 %v600_v50 }
 0x380   : > { %v603_v52 = vsel %vm405_vm9, %v594_v51, 0 }
 0x381   : > { %623 = vmatpush.bf16.msra.mxu3 %v603_v52 }
 0x382   : > { %v498_v54 = vpop.permute.xlu0 %497 }
 0x383   : > { %v499_v56 = vsel %vm280_vm8, %v496_v53, %v498_v54  ;;  %v500_v57 = vsel %vm280_vm8, %v498_v54, %v496_v53  ;;  %v580_v5 = vld [vmem:[#allocation2] sm:$0xff] }
 0x384   : > { %v501_v58 = vsel %vm229_vm6, %v499_v56, %v494_v55  ;;  %v504_v59 = vsel %vm232_vm7, %v493_v46, %v500_v57  ;;  %515 = vst [vmem:[#allocation2 + $0x48] sm:$0xf] %v499_v56  ;;  %v590_v7 = vpack.c.bf16 %v582_v13, %v580_v5 }
 0x385   : > { %505 = vst [vmem:[#allocation2 + $0x20] sm:$0xf] %v501_v58 }
 0x386   : > { %516 = vst [vmem:[#allocation2 + $0x38] sm:$0xf] %v504_v59 }
 0x38b   : > { %v585_v61 = vld [vmem:[#allocation2 + $0x48] sm:$0xff] }
 0x38c   : > { %v591_v62 = vpack.c.bf16 %v585_v61, %v583_v60  ;;  %v579_v2 = vld [vmem:[#allocation2 + $0x20] sm:$0xff] }
 0x38d   : > { %v586_v1 = vld [vmem:[#allocation2 + $0x38] sm:$0xff]  ;;  %v589_v6 = vpack.c.bf16 %v581_v4, %v579_v2 }
 0x38e   : > { %611 = vmatpush.bf16.msra.mxu2 %v591_v62  ;;  %v592_v3 = vpack.c.bf16 %v586_v1, %v584_v63 }
 0x390   : > { %624 = vmatpush.bf16.msra.mxu3 %v592_v3 }
 0x392   : > { %612 = vmatpush.bf16.msra.mxu2 %v589_v6 }
 0x394   : > { %625 = vmatpush.bf16.msra.mxu3 %v590_v7 }
 0x395   : > { %791 = vmatmul.msk.bf16.vlgmr.msra.gmra.mxu2 %vm401_vm10, %v595_v14 }
 0x397   : > { %792 = vmatmul.msk.bf16.vlgmr.msra.gmra.mxu3 %vm401_vm10, %v595_v14 }
 0x418   : > { %v614_v8 = vpop.f32.mrf.mxu2 }
 0x419   : > { %v636_v9 = vmul.f32 %v614_v8, %v614_v8  ;;  %v631_v10 = vsel %vm438_vm11, %v614_v8, 0.0 }
 0x41a   : > { %v627_v11 = vpop.f32.mrf.mxu3 }
 0x41b   : > { %v637_v12 = vmul.f32 %v627_v11, %v627_v11  ;;  %v632_v15 = vsel %vm438_vm11, %v627_v11, 0.0  ;;  %v638_v16 = vsel %vm438_vm11, %v636_v9, 0.0 }
 0x41c   : > { %v633_v17 = vadd.f32 %v632_v15, %v631_v10 }
 0x41d   : > { %v639_v18 = vsel %vm438_vm11, %v637_v12, 0.0 }
 0x41e   : > { %634 = vadd.xlane.f32.xlu2 %v633_v17  ;;  %v640_v23 = vadd.f32 %v639_v18, %v638_v16 }
 0x420   : > { %641 = vadd.xlane.f32.xlu1 %v640_v23  ;;  %v616_v24 = vpop.f32.mrf.mxu2 }
 0x422   : > { %v629_v25 = vpop.f32.mrf.mxu3 }
 0x491   : > { %v635_v26 = vpop.xlane.xlu2 %634 }
 0x492   : > { %v643_v20 = vmul.f32 0.00390625, %v635_v26 }
 0x493   : > { %v642_v19 = vpop.xlane.xlu1 %641 }
 0x494   : > { %v644_v21 = vmul.f32 0.00390625, %v642_v19  ;;  %v645_v22 = vmul.f32 %v643_v20, %v643_v20  ;;  %v649_v36 = vsub.f32 %v627_v11, %v643_v20  ;;  %v648_v38 = vsub.f32 %v614_v8, %v643_v20 }
 0x496   : > { %v646_v27 = vsub.f32 %v644_v21, %v645_v22 }
 0x498   : > { %v647_v28 = vmax.f32 %v646_v27, 0.0 }
 0x49a   : > { %v650_v29 = vadd.f32 1e-05, %v647_v28 }
 0x49c   : > { %873 = vrsqrt.f32 %v650_v29  ;;  %vm657_vm0 = vweird.f32 %v650_v29 }
 0x4a2   : > { %v874_v30 = vpop.eup %873 }
 0x4a3   : > { %v652_v31 = vmul.f32 %v874_v30, %v650_v29  ;;  %vm658_vm15 = vweird.f32 %v874_v30 }
 0x4a4   : > { %vm659_vm1 = vmor %vm657_vm0, %vm658_vm15 }
 0x4a5   : > { %v653_v32 = vmul.f32 %v874_v30, %v652_v31 }
 0x4a7   : > { %v654_v33 = vmul.f32 0.5, %v653_v32 }
 0x4a9   : > { %v655_v34 = vsub.f32 1.5, %v654_v33 }
 0x4ab   : > { %v656_v35 = vmul.f32 %v874_v30, %v655_v34 }
 0x4ad   : > { %v660_v37 = vsel %vm659_vm1, %v874_v30, %v656_v35 }
 0x4ae   : > { %v662_v39 = vmul.f32 %v660_v37, %v649_v36  ;;  %v661_v40 = vmul.f32 %v660_v37, %v648_v38 }
 0x4b0   : > { %v665_v41 = vrot.slane %v662_v39, 4 }
 0x4b2   : > { %v666_v42 = vsel %vm438_vm11, %v661_v40, %v665_v41 }
 0x4b3   : > { %v668_v43 = vadd.f32 %v666_v42, %v1173_v0 }
 0x4b5   : > { %669 = vst [vmem:[%s217_s29] sm:$0xff] %v668_v43 }
 0x4b6   : > { %992 = shalt.err (!%p989_p11)
}
 0x4b7   : > { %810 = dma.vmem_to_hbm [thread:$0]  (%p1129_p3), %s685_s30, 128, %s687_s5, %s671_s16  }
 0x4b8 PF: > { %s698_s9 = sand.u32 1, %s1023_s12   ;;  %p1414_p12 = scmp.ge.s32.totalorder %s1035_s15, 2 }
 0x4b9   : > { %s699_s18 = scalar_lea.sflag [#allocation5], %s698_s9 }
 0x4ba   : > { %p824_p13 = pnand %p1414_p12, %p1098_p6 }
 0x4bc   : > { %p825_p0 = pneg %p824_p13 }
 0x4be   : > { %1018 = dma.done.wait (%p825_p0), %s699_s18, 128  }
 0x4bf   : > { %1020 = vsyncadd (%p825_p0), %s699_s18, 4294967168  ;;  %p17_p5 = scmp.ge.s32.totalorder %s1119_s4, 4   ;;  %s1415_s12 = smov %s1027_s13 }
 0x4c0   : > { %s1416_s13 = smov %s1031_s14  ;;  %s1417_s14 = smov %s1135_s8 }
 0x4c1   : > { %s1418_s15 = smov %s1119_s4  ;;  %19 = sbr.rel (!%p17_p5) target bundleno = 6 (0x6), region = 85 }
 0x4c6   :  { %705 = vsyncpa [#allocation4], 1 }
 0x4c7   :  { %707 = vsyncpa [#allocation4 + $0x1], 1 }
 0x4c8   :  { %708 = vsyncpa [#allocation7], 1 }
 0x4c9   :  { %709 = vsyncpa [#allocation5], 1 }
 0x4ca   :  { %711 = vsyncpa [#allocation5 + $0x1], 1 }

</bundles_post_ra>
